<compile_context>
chip_gen: v5e
topology: v5e:2x2
jax: 0.10.0
libtpu: 0.0.40
codegen_flags: <defaults>
</compile_context>

<pallas_src>
import jax
import jax.numpy as jnp
from jax.experimental import pallas as pl
from jax.experimental.pallas import tpu as pltpu


S_TILE_MAX = 2048  # lane tile cap (multiple of 128); plenty of VMEM headroom


def conv1x1_relu6_kernel(w_ref, b_ref, x_ref, o_ref):
    # w_ref: (Cout, Cin) f32 VMEM (full array)
    # b_ref: (Cout, 1)   f32 VMEM (full array)
    # x_ref: (Cin, S_tile)  VMEM block
    # o_ref: (Cout, S_tile) VMEM block
    w = w_ref[...]                                   # (Cout, Cin)
    b = b_ref[...]                                   # (Cout, 1)
    x = x_ref[...].astype(jnp.float32)               # (Cin, S_tile)
    cout, cin = w.shape

    # All Cout rows per input channel at once: (1, S) * (Cout, 1) -> (Cout, S).
    acc = x[0:1, :] * w[:, 0:1] + b                  # fused first FMA + bias
    for c in range(1, cin):                          # fully unrolled (cin = 3)
        acc = acc + x[c:c + 1, :] * w[:, c:c + 1]

    # ReLU6 and a single lane-dense store of the whole (Cout, S_tile) tile.
    o_ref[...] = jnp.clip(acc, 0.0, 6.0).astype(o_ref.dtype)


def _conv1x1_relu6_impl(x_nchw, weight, bias):
    """x_nchw: (N, Cin, H, W); weight: (Cout, Cin, 1, 1); bias: (Cout,).

    Returns the full padded output (N, Cout, H+2, W+2), matching
    Conv2d(kernel_size=1, stride=1, padding=1) + ReLU6.
    """
    n, cin, h, w = x_nchw.shape
    cout = weight.shape[0]
    dtype = x_nchw.dtype
    hp, wp = h + 2, w + 2

    # Zero-pad the input spatially; border outputs fall out of the math
    # (0 * W + bias, clipped) so no separate border pass is needed.
    x_pad = jnp.pad(x_nchw, ((0, 0), (0, 0), (1, 1), (1, 1)))

    # Channels on sublanes, spatial on lanes: (Cin, S) with S = N*Hp*Wp.
    x_flat = jnp.transpose(x_pad, (1, 0, 2, 3)).reshape(cin, n * hp * wp)
    s = x_flat.shape[1]

    # One tile for small problems (grid=1, minimal per-step overhead); capped
    # tile for large problems so the grid axis has >1 step to shard on v7x.
    s_tile = min(S_TILE_MAX, pl.cdiv(s, 128) * 128)
    s_pad = pl.cdiv(s, s_tile) * s_tile
    if s_pad != s:
        x_flat = jnp.pad(x_flat, ((0, 0), (0, s_pad - s)))

    w_mat = weight.reshape(cout, cin).astype(jnp.float32)
    b_col = bias.reshape(cout, 1).astype(jnp.float32)

    out_flat = pl.pallas_call(
        conv1x1_relu6_kernel,
        out_shape=jax.ShapeDtypeStruct((cout, s_pad), dtype),
        grid=(s_pad // s_tile,),
        in_specs=[
            pl.BlockSpec((cout, cin), lambda i: (0, 0)),    # weight (whole)
            pl.BlockSpec((cout, 1), lambda i: (0, 0)),      # bias (whole)
            pl.BlockSpec((cin, s_tile), lambda i: (0, i)),  # x stream
        ],
        out_specs=pl.BlockSpec((cout, s_tile), lambda i: (0, i)),
        # At this size grid=(1,), so this is a no-op; for larger inputs the
        # independent spatial steps may be sharded across v7x's 2 TensorCores.
        compiler_params=pltpu.CompilerParams(
            dimension_semantics=("parallel",)),
    )(w_mat, b_col, x_flat)

    # (Cout, S) -> (N, Cout, Hp, Wp); tail padding columns are sliced off.
    return out_flat[:, :s].reshape(cout, n, hp, wp).transpose(1, 0, 2, 3)


conv1x1_relu6 = jax.jit(_conv1x1_relu6_impl)


if __name__ == "__main__":
    key = jax.random.PRNGKey(0)
    k_x, k_w, k_b = jax.random.split(key, 3)

    # Conv2d(3, 3, kernel_size=1, stride=1, padding=1)
    cin = cout = 3
    n, h, w = 2, 16, 16

    x = jax.random.normal(k_x, (n, cin, h, w), dtype=jnp.float32)
    # Deterministic parameter init (synthetic; roughly PyTorch-style uniform).
    fan_in = cin * 1 * 1
    bound = 1.0 / (fan_in ** 0.5)
    weight = jax.random.uniform(k_w, (cout, cin, 1, 1), jnp.float32, -bound, bound)
    bias = jax.random.uniform(k_b, (cout,), jnp.float32, -bound, bound)

    out = conv1x1_relu6(x, weight, bias)
    out = jax.block_until_ready(out)

    # Reference check in plain JAX (same math as the PyTorch module).
    x_pad = jnp.pad(x, ((0, 0), (0, 0), (1, 1), (1, 1)))
    ref = jnp.einsum("nchw,oc->nohw", x_pad, weight.reshape(cout, cin)) \
        + bias[None, :, None, None]
    ref = jnp.clip(ref, 0.0, 6.0)
    assert out.shape == (n, cout, h + 2, w + 2), out.shape
    assert jnp.allclose(out, ref, atol=1e-5), float(jnp.max(jnp.abs(out - ref)))

    print("KERNEL_OK")
</pallas_src>

<mosaic_0001>
module attributes {stable_mosaic.version = 11 : i64} {
  func.func @conv1x1_relu6_kernel(%arg0: i32, %arg1: memref<3x3xf32, #tpu.memory_space<vmem>>, %arg2: memref<3x1xf32, #tpu.memory_space<vmem>>, %arg3: memref<3x768xf32, #tpu.memory_space<vmem>>, %arg4: memref<3x768xf32, #tpu.memory_space<vmem>>) attributes {dimension_semantics = [#tpu.dimension_semantics<parallel>], iteration_bounds = array<i64: 1>, scalar_prefetch = 0 : i64, scratch_operands = 0 : i64, tpu.core_type = #tpu.core_type<tc>, window_params = [{pipeline_mode = #tpu.pipeline_mode<synchronous>, transform_indices = @transform_0, window_bounds = array<i64: 3, 3>}, {pipeline_mode = #tpu.pipeline_mode<synchronous>, transform_indices = @transform_1, window_bounds = array<i64: 3, 1>}, {transform_indices = @transform_2, window_bounds = array<i64: 3, 768>}, {transform_indices = @transform_3, window_bounds = array<i64: 3, 768>}]} {
    %c0 = arith.constant 0 : index
    %c0_0 = arith.constant 0 : index
    %0 = vector.load %arg1[%c0, %c0_0] : memref<3x3xf32, #tpu.memory_space<vmem>>, vector<3x3xf32>
    %c0_1 = arith.constant 0 : index
    %c0_2 = arith.constant 0 : index
    %1 = vector.load %arg2[%c0_1, %c0_2] : memref<3x1xf32, #tpu.memory_space<vmem>>, vector<3x1xf32>
    %c0_3 = arith.constant 0 : index
    %c0_4 = arith.constant 0 : index
    %2 = vector.load %arg3[%c0_3, %c0_4] : memref<3x768xf32, #tpu.memory_space<vmem>>, vector<3x768xf32>
    %3 = vector.extract_strided_slice %2 {offsets = [0, 0], sizes = [1, 768], strides = [1, 1]} : vector<3x768xf32> to vector<1x768xf32>
    %4 = vector.extract_strided_slice %0 {offsets = [0, 0], sizes = [3, 1], strides = [1, 1]} : vector<3x3xf32> to vector<3x1xf32>
    %5 = vector.broadcast %3 : vector<1x768xf32> to vector<3x768xf32>
    %6 = vector.broadcast %4 : vector<3x1xf32> to vector<3x768xf32>
    %7 = arith.mulf %5, %6 : vector<3x768xf32>
    %8 = vector.broadcast %1 : vector<3x1xf32> to vector<3x768xf32>
    %9 = arith.addf %7, %8 : vector<3x768xf32>
    %10 = vector.extract_strided_slice %2 {offsets = [1, 0], sizes = [1, 768], strides = [1, 1]} : vector<3x768xf32> to vector<1x768xf32>
    %11 = vector.extract_strided_slice %0 {offsets = [0, 1], sizes = [3, 1], strides = [1, 1]} : vector<3x3xf32> to vector<3x1xf32>
    %12 = vector.broadcast %10 : vector<1x768xf32> to vector<3x768xf32>
    %13 = vector.broadcast %11 : vector<3x1xf32> to vector<3x768xf32>
    %14 = arith.mulf %12, %13 : vector<3x768xf32>
    %15 = arith.addf %9, %14 : vector<3x768xf32>
    %16 = vector.extract_strided_slice %2 {offsets = [2, 0], sizes = [1, 768], strides = [1, 1]} : vector<3x768xf32> to vector<1x768xf32>
    %17 = vector.extract_strided_slice %0 {offsets = [0, 2], sizes = [3, 1], strides = [1, 1]} : vector<3x3xf32> to vector<3x1xf32>
    %18 = vector.broadcast %16 : vector<1x768xf32> to vector<3x768xf32>
    %19 = vector.broadcast %17 : vector<3x1xf32> to vector<3x768xf32>
    %20 = arith.mulf %18, %19 : vector<3x768xf32>
    %21 = arith.addf %15, %20 : vector<3x768xf32>
    %cst = arith.constant 0.000000e+00 : f32
    %cst_5 = arith.constant 6.000000e+00 : f32
    %22 = vector.broadcast %cst : f32 to vector<3x768xf32>
    %23 = arith.maximumf %22, %21 : vector<3x768xf32>
    %24 = vector.broadcast %cst_5 : f32 to vector<3x768xf32>
    %25 = arith.minimumf %24, %23 : vector<3x768xf32>
    %c0_6 = arith.constant 0 : index
    %c0_7 = arith.constant 0 : index
    %26 = vector.load %arg4[%c0_6, %c0_7] : memref<3x768xf32, #tpu.memory_space<vmem>>, vector<3x768xf32>
    tpu.vector_store %arg4[%c0_6, %c0_7], %25 {strides = array<i32>} : memref<3x768xf32, #tpu.memory_space<vmem>>, vector<3x768xf32>,
    return
  }
  func.func @transform_0(%arg0: i32) -> (i32, i32) {
    %c0_i32 = arith.constant 0 : i32
    %c0_i32_0 = arith.constant 0 : i32
    %c0_i32_1 = arith.constant 0 : i32
    return %c0_i32, %c0_i32_0 : i32, i32
  }
  func.func @transform_1(%arg0: i32) -> (i32, i32) {
    %c0_i32 = arith.constant 0 : i32
    %c0_i32_0 = arith.constant 0 : i32
    %c0_i32_1 = arith.constant 0 : i32
    return %c0_i32, %c0_i32_0 : i32, i32
  }
  func.func @transform_2(%arg0: i32) -> (i32, i32) {
    %c0_i32 = arith.constant 0 : i32
    %c0_i32_0 = arith.constant 0 : i32
    return %c0_i32, %arg0 : i32, i32
  }
  func.func @transform_3(%arg0: i32) -> (i32, i32) {
    %c0_i32 = arith.constant 0 : i32
    %c0_i32_0 = arith.constant 0 : i32
    return %c0_i32, %arg0 : i32, i32
  }
}

</mosaic_0001>

<bundles_post_ra>
// kernel: _conv1x1_relu6_impl.1
= control target key start
LH: loop header
LB: loop body
LE: loop exit
PB: predicated region body
PF: predicated region fallthrough
CT: control target
= control target key end

     0   :  { %v172_v0 = vmov 0   ;;  %v173_v1 = vmov 1   ;;  %v174_v4 = vmov 2   ;;  %vm151_vm0 = vcmask 1043456   ;;  %s219_s0 = inlined_call_operand.vmem [shape: f32[3,3], index: 0, kind: input, shape index: {}]   ;;  %s220_s1 = inlined_call_operand.vmem [shape: f32[3,1], index: 1, kind: input, shape index: {}]   ;;  %s221_s2 = inlined_call_operand.vmem [shape: f32[3,768], index: 2, kind: input, shape index: {}]   ;;  %s222_s3 = inlined_call_operand.vmem [shape: f32[3,768], index: 3, kind: output, shape index: {}]  }
   0x1   :  { %168 = vset.pattern.permute.xlu0 %v172_v0  ;;  %169 = vset.pattern.permute.xlu1 %v173_v1  ;;  %v14_v2 = vld [vmem:[%s219_s0] sm:$0x7]  ;;  %v17_v6 = vld [vmem:[%s221_s2 + $0x8] sm:$0x77]  ;;  %v18_v7 = vld [vmem:[%s221_s2 + $0x10] sm:$0x77] }
   0x2   :  { %42 = vperm.xlu0 %168, %v14_v2   ;;  %81 = vperm.xlu1 %169, %v14_v2   ;;  %v15_v3 = vld [vmem:[%s220_s1] sm:$0x7]  ;;  %v64_v12 = vperm.slane %v17_v6, 1  ;;  %v65_v13 = vperm.slane %v17_v6, 5  ;;  %v66_v14 = vperm.slane %v18_v7, 1  ;;  %v67_v15 = vperm.slane %v18_v7, 5 }
   0x3   :  { %v16_v5 = vld [vmem:[%s221_s2] sm:$0x77]  ;;  %v24_v16 = vperm.slane %v17_v6, 0  ;;  %v25_v17 = vperm.slane %v17_v6, 4  ;;  %v26_v18 = vperm.slane %v18_v7, 0  ;;  %v27_v19 = vperm.slane %v18_v7, 4 }
   0x4   :  { %v62_v8 = vperm.slane %v16_v5, 1  ;;  %v63_v9 = vperm.slane %v16_v5, 5  ;;  %v22_v10 = vperm.slane %v16_v5, 0  ;;  %v23_v11 = vperm.slane %v16_v5, 4 }
   0x5   :  { %v96_v24 = vperm.slane %v16_v5, 2  ;;  %v97_v25 = vperm.slane %v16_v5, 6  ;;  %v98_v26 = vperm.slane %v17_v6, 2  ;;  %v99_v27 = vperm.slane %v17_v6, 6 }
   0x6   :  { %v74_v21 = vperm.slane %v62_v8, 1  ;;  %v75_v22 = vperm.slane %v63_v9, 1  ;;  %v100_v28 = vperm.slane %v18_v7, 2  ;;  %v101_v29 = vperm.slane %v18_v7, 6 }
   0x7   :  { %v76_v30 = vperm.slane %v64_v12, 1  ;;  %v77_v31 = vperm.slane %v65_v13, 1  ;;  %v78_v32 = vperm.slane %v66_v14, 1  ;;  %v79_v33 = vperm.slane %v67_v15, 1 }
   0x8   :  { %v34_v34 = vperm.slane %v22_v10, 0  ;;  %v35_v35 = vperm.slane %v23_v11, 0  ;;  %v36_v36 = vperm.slane %v24_v16, 0  ;;  %v37_v37 = vperm.slane %v25_v17, 0 }
   0x9   :  { %v38_v38 = vperm.slane %v26_v18, 0  ;;  %v39_v39 = vperm.slane %v27_v19, 0  ;;  %v108_v40 = vperm.slane %v96_v24, 2  ;;  %v109_v41 = vperm.slane %v97_v25, 2 }
   0xa   :  { %53 = vperm.xlu0 %168, %v15_v3   ;;  %170 = vset.pattern.permute.xlu1 %v174_v4  ;;  %v110_v42 = vperm.slane %v98_v26, 2  ;;  %v111_v43 = vperm.slane %v99_v27, 2  ;;  %v112_v44 = vperm.slane %v100_v28, 2  ;;  %v113_v45 = vperm.slane %v101_v29, 2 }
   0xb   :  { %115 = vperm.xlu1 %170, %v14_v2  }
  0x12   :  { %171 = vset.pattern.permute.xlu0 %v174_v4 }
  0x74   :  { %v43_v20 = vpop.permute.xlu0 %42  ;;  %v82_v23 = vpop.permute.xlu1 %81 }
  0x75   :  { %v84_v46 = vmul.f32 %v82_v23, %v74_v21  ;;  %v85_v47 = vmul.f32 %v82_v23, %v75_v22  ;;  %v86_v48 = vmul.f32 %v82_v23, %v76_v30  ;;  %v87_v49 = vmul.f32 %v82_v23, %v77_v31 }
  0x76   :  { %v45_v50 = vmul.f32 %v43_v20, %v34_v34  ;;  %v46_v51 = vmul.f32 %v43_v20, %v35_v35  ;;  %v47_v52 = vmul.f32 %v43_v20, %v36_v36  ;;  %v48_v53 = vmul.f32 %v43_v20, %v37_v37 }
  0x77   :  { %v88_v54 = vmul.f32 %v82_v23, %v78_v32  ;;  %v89_v55 = vmul.f32 %v82_v23, %v79_v33  ;;  %v49_v56 = vmul.f32 %v43_v20, %v38_v38  ;;  %v50_v57 = vmul.f32 %v43_v20, %v39_v39 }
  0x7c   :  { %v54_v58 = vpop.permute.xlu0 %53 }
  0x7d   :  { %v56_v59 = vadd.f32 %v54_v58, %v45_v50  ;;  %v57_v60 = vadd.f32 %v54_v58, %v46_v51  ;;  %v58_v61 = vadd.f32 %v54_v58, %v47_v52  ;;  %v59_v62 = vadd.f32 %v54_v58, %v48_v53  ;;  %v116_v63 = vpop.permute.xlu1 %115 }
  0x7e   :  { %v60_v0 = vadd.f32 %v54_v58, %v49_v56  ;;  %v61_v1 = vadd.f32 %v54_v58, %v50_v57  ;;  %v118_v2 = vmul.f32 %v116_v63, %v108_v40  ;;  %v119_v3 = vmul.f32 %v116_v63, %v109_v41 }
  0x7f   :  { %v90_v4 = vadd.f32 %v84_v46, %v56_v59  ;;  %v91_v5 = vadd.f32 %v85_v47, %v57_v60  ;;  %v92_v6 = vadd.f32 %v86_v48, %v58_v61  ;;  %v93_v7 = vadd.f32 %v87_v49, %v59_v62 }
  0x80   :  { %v94_v8 = vadd.f32 %v88_v54, %v60_v0  ;;  %v95_v9 = vadd.f32 %v89_v55, %v61_v1  ;;  %v120_v10 = vmul.f32 %v116_v63, %v110_v42  ;;  %v121_v11 = vmul.f32 %v116_v63, %v111_v43 }
  0x81   :  { %v122_v12 = vmul.f32 %v116_v63, %v112_v44  ;;  %v123_v13 = vmul.f32 %v116_v63, %v113_v45  ;;  %v124_v14 = vadd.f32 %v118_v2, %v90_v4  ;;  %v125_v15 = vadd.f32 %v119_v3, %v91_v5 }
  0x82   :  { %v126_v16 = vadd.f32 %v120_v10, %v92_v6  ;;  %v127_v17 = vadd.f32 %v121_v11, %v93_v7 }
  0x83   :  { %v128_v18 = vadd.f32 %v122_v12, %v94_v8  ;;  %v129_v19 = vadd.f32 %v123_v13, %v95_v9  ;;  %v130_v20 = vmax.f32 %v124_v14, 0.0  ;;  %v131_v21 = vmax.f32 %v125_v15, 0.0 }
  0x84   :  { %v132_v22 = vmax.f32 %v126_v16, 0.0  ;;  %v133_v23 = vmax.f32 %v127_v17, 0.0 }
  0x85   :  { %v134_v24 = vmax.f32 %v128_v18, 0.0  ;;  %v135_v25 = vmax.f32 %v129_v19, 0.0  ;;  %v137_v26 = vmin.f32 %v131_v21, 6.0  ;;  %v136_v28 = vmin.f32 %v130_v20, 6.0 }
  0x86   :  { %v139_v27 = vmin.f32 %v133_v23, 6.0  ;;  %v138_v31 = vmin.f32 %v132_v22, 6.0 }
  0x87   :  { %v141_v29 = vmin.f32 %v135_v25, 6.0  ;;  %v148_v30 = vrot.slane %v137_v26, 4  ;;  %v140_v33 = vmin.f32 %v134_v24, 6.0 }
  0x88   :  { %v149_v32 = vrot.slane %v139_v27, 4 }
  0x89   :  { %v150_v34 = vrot.slane %v141_v29, 4  ;;  %v152_v35 = vsel %vm151_vm0, %v136_v28, %v148_v30 }
  0x8a   :  { %v153_v36 = vsel %vm151_vm0, %v138_v31, %v149_v32  ;;  %158 = vst [vmem:[%s222_s3] sm:$0x77] %v152_v35 }
  0x8b   :  { %v154_v37 = vsel %vm151_vm0, %v140_v33, %v150_v34  ;;  %159 = vst [vmem:[%s222_s3 + $0x8] sm:$0x77] %v153_v36 }
  0x8c   :  { %160 = vst [vmem:[%s222_s3 + $0x10] sm:$0x77] %v154_v37 }

</bundles_post_ra>
